<compile_context>
chip_gen: v5e
topology: v5e:2x2
jax: 0.10.0
libtpu: 0.0.40
codegen_flags: <defaults>
</compile_context>

<pallas_src>
import jax
import jax.numpy as jnp
from jax.experimental import pallas as pl
from jax.experimental.pallas import tpu as pltpu

# Small, module-consistent synthetic shapes.
B = 2          # batch
N = 8          # sequence length
E = 32         # emb_size
H = 4          # num_heads
D = E // H     # head dim
SCALING = float(D) ** -0.5   # matches module: (emb_size // num_heads) ** -0.5


def mha_kernel(x_ref, wqkv_ref, bqkv_ref, wo_ref, bo_ref, o_ref):
    """One batch element per grid step.

    x_ref    : (1, N, E)  f32 input block
    wqkv_ref : (E, 3E)    bf16 fused, pre-transposed QKV weight (SCALING folded into Q)
    bqkv_ref : (1, 3E)    f32 fused QKV bias (SCALING folded into the Q slice)
    wo_ref   : (E, E)     bf16 pre-transposed output-projection weight
    bo_ref   : (1, E)     f32 output-projection bias
    o_ref    : (1, N, E)  output block
    """
    x = x_ref[0].astype(jnp.bfloat16)                                 # (N, E)

    # Fused QKV projection: one bf16 MXU push with 3E output lanes, f32 accum,
    # one fused bias add.  The softmax scale is already baked into W_q / b_q.
    qkv = jnp.dot(x, wqkv_ref[...],
                  preferred_element_type=jnp.float32) + bqkv_ref[0]   # (N, 3E) f32

    q_all = qkv[:, :E].astype(jnp.bfloat16)                           # (N, E)
    v_all = qkv[:, 2 * E:].astype(jnp.bfloat16)                       # (N, E)
    # Single per-block K transpose (one XLU op for all heads).
    kT = qkv[:, E:2 * E].T                                            # (E, N) f32

    # Per-head attention.  H is tiny and compile-time here, so a static slice
    # loop issues the same MXU work as a batched contraction without the
    # (H, N, D) relayout a batched einsum would require.
    # TODO(synk): use lax.fori_loop + VMEM scratch at real H to bound live ranges.
    outs = []
    for h in range(H):
        q_h = q_all[:, h * D:(h + 1) * D]                             # (N, D) bf16
        k_h_t = kT[h * D:(h + 1) * D, :].astype(jnp.bfloat16)         # (D, N) bf16
        v_h = v_all[:, h * D:(h + 1) * D]                             # (N, D) bf16

        s = jnp.dot(q_h, k_h_t, preferred_element_type=jnp.float32)   # (N, N) f32
        # Softmax kept in f32 (v5e has no bf16 VPU/EUP); denominator via the
        # EUP approximate reciprocal (separate bundle slot).
        s = s - jnp.max(s, axis=-1, keepdims=True)
        p = jnp.exp(s)
        inv = pl.reciprocal(jnp.sum(p, axis=-1, keepdims=True), approx=True)
        att = (p * inv).astype(jnp.bfloat16)
        # TODO(synk): attention dropout (p=0.1) omitted (eval-mode identity).
        outs.append(jnp.dot(att, v_h, preferred_element_type=jnp.float32))

    # 'b h n d -> b n (h d)' : lane-concatenate the heads back to (N, E).
    cat = jnp.concatenate(outs, axis=-1).astype(jnp.bfloat16)         # (N, E)

    # Output projection (weight already transposed + bf16 in the wrapper).
    o = jnp.dot(cat, wo_ref[...], preferred_element_type=jnp.float32) + bo_ref[0]
    o_ref[0] = o.astype(o_ref.dtype)


def prepare_params(wq, wk, wv, wo, bq, bk, bv, bo):
    """One-time parameter prep (parameter-load time, NOT per forward call):
    fuse QKV, fold SCALING into the Q slice, pre-transpose, cast weights to bf16."""
    w_qkv = jnp.concatenate([wq * SCALING, wk, wv], axis=0).T.astype(jnp.bfloat16)  # (E, 3E)
    b_qkv = jnp.concatenate([bq * SCALING, bk, bv]).reshape(1, 3 * E).astype(jnp.float32)
    w_o_t = wo.T.astype(jnp.bfloat16)                                               # (E, E)
    b_o = bo.reshape(1, E).astype(jnp.float32)
    return w_qkv, b_qkv, w_o_t, b_o


@jax.jit
def multi_head_attention(x, w_qkv, b_qkv, w_o_t, b_o):
    """x: (B, N, E) f32; params from prepare_params()."""
    def full(shape):
        return pl.BlockSpec(shape, lambda b: (0, 0))

    return pl.pallas_call(
        mha_kernel,
        out_shape=jax.ShapeDtypeStruct((B, N, E), x.dtype),
        grid_spec=pltpu.PrefetchScalarGridSpec(
            num_scalar_prefetch=0,
            grid=(B,),                                    # v7x: one batch elem per TC
            in_specs=[
                pl.BlockSpec((1, N, E), lambda b: (b, 0, 0)),   # x
                full((E, 3 * E)),                               # fused W_qkv (bf16, pre-T, scale-folded)
                full((1, 3 * E)),                               # fused b_qkv
                full((E, E)),                                   # W_o (bf16, pre-T)
                full((1, E)),                                   # b_o
            ],
            out_specs=pl.BlockSpec((1, N, E), lambda b: (b, 0, 0)),
        ),
        compiler_params=pltpu.CompilerParams(
            dimension_semantics=("parallel",),
            vmem_limit_bytes=32 * 1024 * 1024),
    )(x, w_qkv, b_qkv, w_o_t, b_o)


def mha_reference(x, wq, wk, wv, wo, bq, bk, bv, bo):
    """Pure-JAX f32 reference matching the PyTorch forward (eval mode, mask=None)."""
    q = x @ wq.T + bq
    k = x @ wk.T + bk
    v = x @ wv.T + bv

    def split(t):  # b n (h d) -> b h n d
        return t.reshape(B, N, H, D).transpose(0, 2, 1, 3)

    q, k, v = split(q), split(k), split(v)
    energy = jnp.einsum('bhqd,bhkd->bhqk', q, k)
    att = jax.nn.softmax(energy * SCALING, axis=-1)
    out = jnp.einsum('bhal,bhlv->bhav', att, v)
    out = out.transpose(0, 2, 1, 3).reshape(B, N, E)
    return out @ wo.T + bo


if __name__ == "__main__":
    key = jax.random.PRNGKey(0)
    keys = jax.random.split(key, 9)
    scale = 0.05
    x  = jax.random.normal(keys[0], (B, N, E), jnp.float32)
    wq = jax.random.normal(keys[1], (E, E), jnp.float32) * scale
    wk = jax.random.normal(keys[2], (E, E), jnp.float32) * scale
    wv = jax.random.normal(keys[3], (E, E), jnp.float32) * scale
    wo = jax.random.normal(keys[4], (E, E), jnp.float32) * scale
    bq = jax.random.normal(keys[5], (E,), jnp.float32) * scale
    bk = jax.random.normal(keys[6], (E,), jnp.float32) * scale
    bv = jax.random.normal(keys[7], (E,), jnp.float32) * scale
    bo = jax.random.normal(keys[8], (E,), jnp.float32) * scale

    # One-time weight prep (fused/transposed/bf16, scale folded in).
    params = prepare_params(wq, wk, wv, wo, bq, bk, bv, bo)
    params = jax.block_until_ready(params)

    out = multi_head_attention(x, *params)
    out = jax.block_until_ready(out)

    ref = mha_reference(x, wq, wk, wv, wo, bq, bk, bv, bo)
    assert out.shape == (B, N, E)
    # Tolerance relaxed vs. strict f32: bf16 MXU operands + EUP approximate
    # reciprocal in the softmax denominator (expected abs error ~1e-3 at these
    # magnitudes; 2e-2 leaves margin).
    assert jnp.allclose(out, ref, atol=2e-2, rtol=2e-2), "mismatch vs reference"
    print("KERNEL_OK")
</pallas_src>

<mosaic_0001>
module attributes {stable_mosaic.version = 11 : i64} {
  func.func @mha_kernel(%arg0: i32, %arg1: memref<1x8x32xf32, #tpu.memory_space<vmem>>, %arg2: memref<32x96xbf16, #tpu.memory_space<vmem>>, %arg3: memref<1x96xf32, #tpu.memory_space<vmem>>, %arg4: memref<32x32xbf16, #tpu.memory_space<vmem>>, %arg5: memref<1x32xf32, #tpu.memory_space<vmem>>, %arg6: memref<1x8x32xf32, #tpu.memory_space<vmem>>) attributes {dimension_semantics = [#tpu.dimension_semantics<parallel>], iteration_bounds = array<i64: 2>, scalar_prefetch = 0 : i64, scratch_operands = 0 : i64, tpu.core_type = #tpu.core_type<tc>, window_params = [{transform_indices = @transform_0, window_bounds = array<i64: 1, 8, 32>}, {pipeline_mode = #tpu.pipeline_mode<synchronous>, transform_indices = @transform_1, window_bounds = array<i64: 32, 96>}, {pipeline_mode = #tpu.pipeline_mode<synchronous>, transform_indices = @transform_2, window_bounds = array<i64: 1, 96>}, {pipeline_mode = #tpu.pipeline_mode<synchronous>, transform_indices = @transform_3, window_bounds = array<i64: 32, 32>}, {pipeline_mode = #tpu.pipeline_mode<synchronous>, transform_indices = @transform_4, window_bounds = array<i64: 1, 32>}, {transform_indices = @transform_5, window_bounds = array<i64: 1, 8, 32>}]} {
    %c0 = arith.constant 0 : index
    %c0_0 = arith.constant 0 : index
    %c0_1 = arith.constant 0 : index
    %0 = vector.load %arg1[%c0, %c0_0, %c0_1] : memref<1x8x32xf32, #tpu.memory_space<vmem>>, vector<1x8x32xf32>
    %1 = vector.shape_cast %0 : vector<1x8x32xf32> to vector<8x32xf32>
    %2 = arith.truncf %1 : vector<8x32xf32> to vector<8x32xbf16>
    %c0_2 = arith.constant 0 : index
    %c0_3 = arith.constant 0 : index
    %3 = vector.load %arg2[%c0_2, %c0_3] : memref<32x96xbf16, #tpu.memory_space<vmem>>, vector<32x96xbf16>
    %cst = arith.constant dense<0.000000e+00> : vector<8x96xf32>
    %4 = tpu.matmul %2, %3, %cst {dimension_numbers = #tpu.dot_dimension_numbers<[1], [0], [0], [1], [0, 0, 1, 1], [], []>} : vector<8x32xbf16>, vector<32x96xbf16>, vector<8x96xf32> -> vector<8x96xf32>
    %c0_4 = arith.constant 0 : index
    %c0_5 = arith.constant 0 : index
    %5 = vector.load %arg3[%c0_4, %c0_5] : memref<1x96xf32, #tpu.memory_space<vmem>>, vector<1x96xf32>
    %6 = vector.shape_cast %5 : vector<1x96xf32> to vector<96xf32>
    %7 = vector.shape_cast %6 : vector<96xf32> to vector<1x96xf32>
    %8 = vector.broadcast %7 : vector<1x96xf32> to vector<8x96xf32>
    %9 = arith.addf %4, %8 : vector<8x96xf32>
    %10 = vector.extract_strided_slice %9 {offsets = [0, 0], sizes = [8, 32], strides = [1, 1]} : vector<8x96xf32> to vector<8x32xf32>
    %11 = arith.truncf %10 : vector<8x32xf32> to vector<8x32xbf16>
    %12 = vector.extract_strided_slice %9 {offsets = [0, 64], sizes = [8, 32], strides = [1, 1]} : vector<8x96xf32> to vector<8x32xf32>
    %13 = arith.truncf %12 : vector<8x32xf32> to vector<8x32xbf16>
    %14 = vector.extract_strided_slice %9 {offsets = [0, 32], sizes = [8, 32], strides = [1, 1]} : vector<8x96xf32> to vector<8x32xf32>
    %15 = tpu.transpose %14, [1, 0] : vector<8x32xf32> -> vector<32x8xf32>
    %16 = vector.extract_strided_slice %11 {offsets = [0, 0], sizes = [8, 8], strides = [1, 1]} : vector<8x32xbf16> to vector<8x8xbf16>
    %17 = vector.extract_strided_slice %15 {offsets = [0, 0], sizes = [8, 8], strides = [1, 1]} : vector<32x8xf32> to vector<8x8xf32>
    %18 = arith.truncf %17 : vector<8x8xf32> to vector<8x8xbf16>
    %19 = vector.extract_strided_slice %13 {offsets = [0, 0], sizes = [8, 8], strides = [1, 1]} : vector<8x32xbf16> to vector<8x8xbf16>
    %cst_6 = arith.constant dense<0.000000e+00> : vector<8x8xf32>
    %20 = tpu.matmul %16, %18, %cst_6 {dimension_numbers = #tpu.dot_dimension_numbers<[1], [0], [0], [1], [0, 0, 1, 1], [], []>} : vector<8x8xbf16>, vector<8x8xbf16>, vector<8x8xf32> -> vector<8x8xf32>
    %cst_7 = arith.constant dense<0xFF800000> : vector<8xf32>
    %21 = vector.multi_reduction <maximumf>, %20, %cst_7 [1] : vector<8x8xf32> to vector<8xf32>
    %22 = vector.shape_cast %21 : vector<8xf32> to vector<8x1xf32>
    %23 = vector.broadcast %22 : vector<8x1xf32> to vector<8x8xf32>
    %24 = arith.subf %20, %23 : vector<8x8xf32>
    %25 = math.exp %24 : vector<8x8xf32>
    %cst_8 = arith.constant dense<0.000000e+00> : vector<8xf32>
    %26 = vector.multi_reduction <add>, %25, %cst_8 [1] : vector<8x8xf32> to vector<8xf32>
    %27 = vector.shape_cast %26 : vector<8xf32> to vector<8x1xf32>
    %28 = tpu.reciprocal %27 {approx = true} : vector<8x1xf32> -> vector<8x1xf32>
    %29 = vector.broadcast %28 : vector<8x1xf32> to vector<8x8xf32>
    %30 = arith.mulf %25, %29 : vector<8x8xf32>
    %31 = arith.truncf %30 : vector<8x8xf32> to vector<8x8xbf16>
    %cst_9 = arith.constant dense<0.000000e+00> : vector<8x8xf32>
    %32 = tpu.matmul %31, %19, %cst_9 {dimension_numbers = #tpu.dot_dimension_numbers<[1], [0], [0], [1], [0, 0, 1, 1], [], []>} : vector<8x8xbf16>, vector<8x8xbf16>, vector<8x8xf32> -> vector<8x8xf32>
    %33 = vector.extract_strided_slice %11 {offsets = [0, 8], sizes = [8, 8], strides = [1, 1]} : vector<8x32xbf16> to vector<8x8xbf16>
    %34 = vector.extract_strided_slice %15 {offsets = [8, 0], sizes = [8, 8], strides = [1, 1]} : vector<32x8xf32> to vector<8x8xf32>
    %35 = arith.truncf %34 : vector<8x8xf32> to vector<8x8xbf16>
    %36 = vector.extract_strided_slice %13 {offsets = [0, 8], sizes = [8, 8], strides = [1, 1]} : vector<8x32xbf16> to vector<8x8xbf16>
    %cst_10 = arith.constant dense<0.000000e+00> : vector<8x8xf32>
    %37 = tpu.matmul %33, %35, %cst_10 {dimension_numbers = #tpu.dot_dimension_numbers<[1], [0], [0], [1], [0, 0, 1, 1], [], []>} : vector<8x8xbf16>, vector<8x8xbf16>, vector<8x8xf32> -> vector<8x8xf32>
    %cst_11 = arith.constant dense<0xFF800000> : vector<8xf32>
    %38 = vector.multi_reduction <maximumf>, %37, %cst_11 [1] : vector<8x8xf32> to vector<8xf32>
    %39 = vector.shape_cast %38 : vector<8xf32> to vector<8x1xf32>
    %40 = vector.broadcast %39 : vector<8x1xf32> to vector<8x8xf32>
    %41 = arith.subf %37, %40 : vector<8x8xf32>
    %42 = math.exp %41 : vector<8x8xf32>
    %cst_12 = arith.constant dense<0.000000e+00> : vector<8xf32>
    %43 = vector.multi_reduction <add>, %42, %cst_12 [1] : vector<8x8xf32> to vector<8xf32>
    %44 = vector.shape_cast %43 : vector<8xf32> to vector<8x1xf32>
    %45 = tpu.reciprocal %44 {approx = true} : vector<8x1xf32> -> vector<8x1xf32>
    %46 = vector.broadcast %45 : vector<8x1xf32> to vector<8x8xf32>
    %47 = arith.mulf %42, %46 : vector<8x8xf32>
    %48 = arith.truncf %47 : vector<8x8xf32> to vector<8x8xbf16>
    %cst_13 = arith.constant dense<0.000000e+00> : vector<8x8xf32>
    %49 = tpu.matmul %48, %36, %cst_13 {dimension_numbers = #tpu.dot_dimension_numbers<[1], [0], [0], [1], [0, 0, 1, 1], [], []>} : vector<8x8xbf16>, vector<8x8xbf16>, vector<8x8xf32> -> vector<8x8xf32>
    %50 = vector.extract_strided_slice %11 {offsets = [0, 16], sizes = [8, 8], strides = [1, 1]} : vector<8x32xbf16> to vector<8x8xbf16>
    %51 = vector.extract_strided_slice %15 {offsets = [16, 0], sizes = [8, 8], strides = [1, 1]} : vector<32x8xf32> to vector<8x8xf32>
    %52 = arith.truncf %51 : vector<8x8xf32> to vector<8x8xbf16>
    %53 = vector.extract_strided_slice %13 {offsets = [0, 16], sizes = [8, 8], strides = [1, 1]} : vector<8x32xbf16> to vector<8x8xbf16>
    %cst_14 = arith.constant dense<0.000000e+00> : vector<8x8xf32>
    %54 = tpu.matmul %50, %52, %cst_14 {dimension_numbers = #tpu.dot_dimension_numbers<[1], [0], [0], [1], [0, 0, 1, 1], [], []>} : vector<8x8xbf16>, vector<8x8xbf16>, vector<8x8xf32> -> vector<8x8xf32>
    %cst_15 = arith.constant dense<0xFF800000> : vector<8xf32>
    %55 = vector.multi_reduction <maximumf>, %54, %cst_15 [1] : vector<8x8xf32> to vector<8xf32>
    %56 = vector.shape_cast %55 : vector<8xf32> to vector<8x1xf32>
    %57 = vector.broadcast %56 : vector<8x1xf32> to vector<8x8xf32>
    %58 = arith.subf %54, %57 : vector<8x8xf32>
    %59 = math.exp %58 : vector<8x8xf32>
    %cst_16 = arith.constant dense<0.000000e+00> : vector<8xf32>
    %60 = vector.multi_reduction <add>, %59, %cst_16 [1] : vector<8x8xf32> to vector<8xf32>
    %61 = vector.shape_cast %60 : vector<8xf32> to vector<8x1xf32>
    %62 = tpu.reciprocal %61 {approx = true} : vector<8x1xf32> -> vector<8x1xf32>
    %63 = vector.broadcast %62 : vector<8x1xf32> to vector<8x8xf32>
    %64 = arith.mulf %59, %63 : vector<8x8xf32>
    %65 = arith.truncf %64 : vector<8x8xf32> to vector<8x8xbf16>
    %cst_17 = arith.constant dense<0.000000e+00> : vector<8x8xf32>
    %66 = tpu.matmul %65, %53, %cst_17 {dimension_numbers = #tpu.dot_dimension_numbers<[1], [0], [0], [1], [0, 0, 1, 1], [], []>} : vector<8x8xbf16>, vector<8x8xbf16>, vector<8x8xf32> -> vector<8x8xf32>
    %67 = vector.extract_strided_slice %11 {offsets = [0, 24], sizes = [8, 8], strides = [1, 1]} : vector<8x32xbf16> to vector<8x8xbf16>
    %68 = vector.extract_strided_slice %15 {offsets = [24, 0], sizes = [8, 8], strides = [1, 1]} : vector<32x8xf32> to vector<8x8xf32>
    %69 = arith.truncf %68 : vector<8x8xf32> to vector<8x8xbf16>
    %70 = vector.extract_strided_slice %13 {offsets = [0, 24], sizes = [8, 8], strides = [1, 1]} : vector<8x32xbf16> to vector<8x8xbf16>
    %cst_18 = arith.constant dense<0.000000e+00> : vector<8x8xf32>
    %71 = tpu.matmul %67, %69, %cst_18 {dimension_numbers = #tpu.dot_dimension_numbers<[1], [0], [0], [1], [0, 0, 1, 1], [], []>} : vector<8x8xbf16>, vector<8x8xbf16>, vector<8x8xf32> -> vector<8x8xf32>
    %cst_19 = arith.constant dense<0xFF800000> : vector<8xf32>
    %72 = vector.multi_reduction <maximumf>, %71, %cst_19 [1] : vector<8x8xf32> to vector<8xf32>
    %73 = vector.shape_cast %72 : vector<8xf32> to vector<8x1xf32>
    %74 = vector.broadcast %73 : vector<8x1xf32> to vector<8x8xf32>
    %75 = arith.subf %71, %74 : vector<8x8xf32>
    %76 = math.exp %75 : vector<8x8xf32>
    %cst_20 = arith.constant dense<0.000000e+00> : vector<8xf32>
    %77 = vector.multi_reduction <add>, %76, %cst_20 [1] : vector<8x8xf32> to vector<8xf32>
    %78 = vector.shape_cast %77 : vector<8xf32> to vector<8x1xf32>
    %79 = tpu.reciprocal %78 {approx = true} : vector<8x1xf32> -> vector<8x1xf32>
    %80 = vector.broadcast %79 : vector<8x1xf32> to vector<8x8xf32>
    %81 = arith.mulf %76, %80 : vector<8x8xf32>
    %82 = arith.truncf %81 : vector<8x8xf32> to vector<8x8xbf16>
    %cst_21 = arith.constant dense<0.000000e+00> : vector<8x8xf32>
    %83 = tpu.matmul %82, %70, %cst_21 {dimension_numbers = #tpu.dot_dimension_numbers<[1], [0], [0], [1], [0, 0, 1, 1], [], []>} : vector<8x8xbf16>, vector<8x8xbf16>, vector<8x8xf32> -> vector<8x8xf32>
    %84 = tpu.concatenate %32, %49, %66, %83 in 1 : vector<8x8xf32>, vector<8x8xf32>, vector<8x8xf32>, vector<8x8xf32> -> vector<8x32xf32>
    %85 = arith.truncf %84 : vector<8x32xf32> to vector<8x32xbf16>
    %c0_22 = arith.constant 0 : index
    %c0_23 = arith.constant 0 : index
    %86 = vector.load %arg4[%c0_22, %c0_23] : memref<32x32xbf16, #tpu.memory_space<vmem>>, vector<32x32xbf16>
    %cst_24 = arith.constant dense<0.000000e+00> : vector<8x32xf32>
    %87 = tpu.matmul %85, %86, %cst_24 {dimension_numbers = #tpu.dot_dimension_numbers<[1], [0], [0], [1], [0, 0, 1, 1], [], []>} : vector<8x32xbf16>, vector<32x32xbf16>, vector<8x32xf32> -> vector<8x32xf32>
    %c0_25 = arith.constant 0 : index
    %c0_26 = arith.constant 0 : index
    %88 = vector.load %arg5[%c0_25, %c0_26] : memref<1x32xf32, #tpu.memory_space<vmem>>, vector<1x32xf32>
    %89 = vector.shape_cast %88 : vector<1x32xf32> to vector<32xf32>
    %90 = vector.shape_cast %89 : vector<32xf32> to vector<1x32xf32>
    %91 = vector.broadcast %90 : vector<1x32xf32> to vector<8x32xf32>
    %92 = arith.addf %87, %91 : vector<8x32xf32>
    %c0_27 = arith.constant 0 : index
    %c0_28 = arith.constant 0 : index
    %c0_29 = arith.constant 0 : index
    %93 = vector.load %arg6[%c0_27, %c0_28, %c0_29] : memref<1x8x32xf32, #tpu.memory_space<vmem>>, vector<1x8x32xf32>
    %94 = vector.shape_cast %93 : vector<1x8x32xf32> to vector<8x32xf32>
    %95 = vector.shape_cast %92 : vector<8x32xf32> to vector<1x8x32xf32>
    tpu.vector_store %arg6[%c0_27, %c0_28, %c0_29], %95 {strides = array<i32>} : memref<1x8x32xf32, #tpu.memory_space<vmem>>, vector<1x8x32xf32>,
    return
  }
  func.func @transform_0(%arg0: i32) -> (i32, i32, i32) {
    %c0_i32 = arith.constant 0 : i32
    %c0_i32_0 = arith.constant 0 : i32
    %c0_i32_1 = arith.constant 0 : i32
    return %arg0, %c0_i32, %c0_i32_0 : i32, i32, i32
  }
  func.func @transform_1(%arg0: i32) -> (i32, i32) {
    %c0_i32 = arith.constant 0 : i32
    %c0_i32_0 = arith.constant 0 : i32
    %c0_i32_1 = arith.constant 0 : i32
    return %c0_i32, %c0_i32_0 : i32, i32
  }
  func.func @transform_2(%arg0: i32) -> (i32, i32) {
    %c0_i32 = arith.constant 0 : i32
    %c0_i32_0 = arith.constant 0 : i32
    %c0_i32_1 = arith.constant 0 : i32
    return %c0_i32, %c0_i32_0 : i32, i32
  }
  func.func @transform_3(%arg0: i32) -> (i32, i32) {
    %c0_i32 = arith.constant 0 : i32
    %c0_i32_0 = arith.constant 0 : i32
    %c0_i32_1 = arith.constant 0 : i32
    return %c0_i32, %c0_i32_0 : i32, i32
  }
  func.func @transform_4(%arg0: i32) -> (i32, i32) {
    %c0_i32 = arith.constant 0 : i32
    %c0_i32_0 = arith.constant 0 : i32
    %c0_i32_1 = arith.constant 0 : i32
    return %c0_i32, %c0_i32_0 : i32, i32
  }
  func.func @transform_5(%arg0: i32) -> (i32, i32, i32) {
    %c0_i32 = arith.constant 0 : i32
    %c0_i32_0 = arith.constant 0 : i32
    %c0_i32_1 = arith.constant 0 : i32
    return %arg0, %c0_i32, %c0_i32_0 : i32, i32, i32
  }
}

</mosaic_0001>

<bundles_post_ra>
// kernel: multi_head_attention.1
= control target key start
LH: loop header
LB: loop body
LE: loop exit
PB: predicated region body
PF: predicated region fallthrough
CT: control target
= control target key end

     0   :  { %10 = vsyncpa [#allocation3], 0  ;;  %s1279_s0 = inlined_call_operand.hbm [shape: f32[2,8,32], index: 0, kind: input, shape index: {}]   ;;  %s1280_s1 = inlined_call_operand.hbm [shape: bf16[32,96], index: 1, kind: input, shape index: {}]   ;;  %s1281_s2 = inlined_call_operand.vmem [shape: f32[1,96], index: 2, kind: input, shape index: {}]   ;;  %s1282_s3 = inlined_call_operand.hbm [shape: bf16[32,32], index: 3, kind: input, shape index: {}]   ;;  %s1283_s4 = inlined_call_operand.vmem [shape: f32[1,32], index: 4, kind: input, shape index: {}]   ;;  %s1284_s5 = inlined_call_operand.hbm [shape: f32[2,8,32], index: 5, kind: output, shape index: {}]  }
   0x1   :  { %12 = vsyncpa [#allocation3 + $0x1], 0 }
   0x2   :  { %13 = vsyncpa [#allocation6], 0 }
   0x3   :  { %14 = vsyncpa [#allocation4], 0 }
   0x4   :  { %16 = vsyncpa [#allocation4 + $0x1], 0  ;;  %s1087_s18 = smov 0   ;;  %s1089_s19 = smov 0  }
   0x5   :  { %s1091_s20 = smov 0   ;;  %s1093_s21 = smov 0  }
   0x6 LB: > { %s174_s24 = sshll.u32 %s1280_s1, 4  ;;  %s1111_s25 = sadd.s32 4294967295, %s1040_s21   ;;  %s1040_s21 = sphi %s1093_s21, %s1295_s21   ;;  %s1036_s20 = sphi %s1091_s20, %s1294_s20   ;;  %s1032_s19 = sphi %s1089_s19, %s1293_s19   ;;  %s1028_s18 = sphi %s1087_s18, %s1292_s18   ;;  %s175_s24 = int_to_ptr.hbm [resolvable:$true] %s174_s24 }
   0x7   : > { %p736_p0 = scmp.ge.s32.totalorder %s1040_s21, 1  ;;  %p43_p1 = scmp.eq.s32.totalorder %s1111_s25, 0 }
   0x8   : > { %p163_p2 = scmp.lt.s32.totalorder %s1040_s21, 3  ;;  %s1042_s27 = smov [#allocation5]  }
   0x9   : > { %s176_s28 = sshll.u32 %s1042_s27, 4  ;;  %s191_s6 = sshll.u32 %s1282_s3, 4  ;;  %s177_s28 = int_to_ptr.vmem [resolvable:$true] %s176_s28  ;;  %s192_s6 = int_to_ptr.hbm [resolvable:$true] %s191_s6 }
   0xa   : > { %p1116_p3 = pnand %p736_p0, %p163_p2  ;;  %s1043_s7 = smov [#allocation7]  }
   0xb   : > { %s193_s8 = sshll.u32 %s1043_s7, 4  ;;  %s1044_s9 = smov 64   ;;  %s194_s8 = int_to_ptr.vmem [resolvable:$true] %s193_s8 }
   0xc   : > { %p793_p4 = pneg %p1116_p3  ;;  %s1045_s10 = smov 4  }
   0xd   : > { %s735_s11 = sadd.s32 4294967294, %s1040_s21   ;;  %s1130_s12 = sadd.s32 1, %s1040_s21  }
   0xe   : > { %p794_p6 = pnand %p793_p4, %p43_p1  ;;  %s26_s13 = ssub.s32 %s1040_s21, %s1130_s12 }
   0xf   : > { %s29_s14 = sadd.s32 1, %s1036_s20  ;;  %p27_p7 = scmp.eq.s32.totalorder %s26_s13, 0 }
  0x10   : > { %796 = dma.hbm_to_vmem [thread:$0]  (!%p794_p6), %s175_s24, 256, %s177_s28, [#allocation6], %s1044_s9, %s1044_s9, %s1045_s10  }
  0x11   : > { %799 = dma.hbm_to_vmem [thread:$0]  (!%p794_p6), %s192_s6, 256, %s194_s8, [#allocation6], %s1044_s9, %s1044_s9, %s1045_s10  }
  0x12   : > { %p36_p8 = scmp.ne.s32.totalorder %s1036_s20, %s1032_s19  ;;  %p37_p9 = scmp.eq.s32.totalorder %s1040_s21, 0 }
  0x13   : > { %p42_p10 = scmp.ne.s32.totalorder %s1032_s19, %s1028_s18  ;;  %p150_p13 = scmp.eq.s32.totalorder %s1111_s25, 1 }
  0x14   : > { %s1141_s15 = scalar_select %p27_p7, %s1036_s20, %s29_s14  }
  0x15   : > { %p1143_p11 = por %p37_p9, %p36_p8  ;;  %p1149_p12 = por %p43_p1, %p42_p10 }
  0x16   : > { %p156_p0 = scmp.eq.s32.totalorder %s735_s11, 1  ;;  %p810_p2 = scmp.lt.s32.totalorder %s1040_s21, 2 }
  0x17   : > { %s210_s22 = sand.u32 1, %s1036_s20   ;;  %p1156_p4 = por %p150_p13, %p36_p8 }
  0x18   : > { %p1160_p6 = por %p156_p0, %p42_p10  ;;  %s740_s27 = sshll.u32 %s210_s22, 3 }
  0x19   : > { %s741_s28 = sshll.u32 %s1040_s21, 3  ;;  %s214_s7 = scalar_lea.vmem [#allocation2], %s740_s27 }
  0x1a   : > { %s218_s6 = scalar_lea.hbm %s1279_s0, %s741_s28  ;;  %s222_s8 = sshll.u32 %s214_s7, 4  ;;  %s223_s8 = int_to_ptr.vmem [resolvable:$true] %s222_s8 }
  0x1b   : > { %s220_s9 = sshll.u32 %s218_s6, 4  ;;  %p1170_p7 = pnand %p810_p2, %p1143_p11  ;;  %s221_s9 = int_to_ptr.hbm [resolvable:$true] %s220_s9 }
  0x1c   : > { %s211_s11 = scalar_lea.sflag [#allocation3], %s210_s22  ;;  %s940_s13 = sshra.s32 %s221_s9, 4  ;;  %s941_s13 = int_to_ptr.hbm [resolvable:$true] %s940_s13 }
  0x1d   : > { %s942_s14 = scalar_lea.hbm %s941_s13, 8  ;;  %p944_p9 = pneg %p1170_p7 }
  0x1e   : > { %p943_p8 = scmp.ne.s32.totalorder %s941_s13, %s942_s14  ;;  %s947_s29 = scalar_lea.hbm %s1279_s0, 16 }
  0x1f   : > { %p948_p11 = scmp.lt.s32.totalorder %s941_s13, %s1279_s0  ;;  %p949_p0 = scmp.lt.s32.totalorder %s947_s29, %s942_s14 }
  0x20   : > { %p945_p10 = pnand %p944_p9, %p943_p8 }
  0x21   : > { %p950_p2 = por %p949_p0, %p948_p11 }
  0x22   : > { %p946_p13 = pneg %p945_p10 }
  0x24   : > { %p951_p5 = pnand %p950_p2, %p946_p13 }
  0x26   : > { %954 = shalt.err (!%p951_p5)
}
  0x27   : > { %803 = dma.hbm_to_vmem [thread:$0]  (!%p1170_p7), %s221_s9, 128, %s223_s8, %s211_s11  }
  0x28   : > { %231 = sbr.rel (%p1116_p3) target bundleno = 1633 (0x661), region = 40  ;;  %s1187_s22 = sand.u32 (!%p1116_p3), 1, %s1032_s19  }
  0x29   : > { %s743_s6 = sshll.u32 (!%p1116_p3), %s1187_s22, 3  ;;  %s234_s7 = scalar_lea.sflag (!%p1116_p3), [#allocation3], %s1187_s22 }
  0x2a   : > { %s237_s13 = scalar_lea.vmem (!%p1116_p3), [#allocation2], %s743_s6 }
  0x2d   : > { %1015 = dma.done.wait (%p1149_p12), %s234_s7, 128  }
  0x2e   : > { %1017 = vsyncadd (%p1149_p12), %s234_s7, 4294967168 }
  0x2f   : > { %1019 = dma.done.wait (%p43_p1), [#allocation6], 512  }
  0x30   : > { %1021 = vsyncadd (%p43_p1), [#allocation6], 4294966784  ;;  %v778_v0 = vld [vmem:[#allocation5 + $0x8] sm:$0xff]  ;;  %v777_v1 = vld [vmem:[#allocation5] sm:$0xff]  ;;  %vm298_vm0 = vcmask 261120   ;;  %s1046_s17 = smov 96  }
  0x31   : > { %308 = vmatpush.bf16.msra.mxu0 %v778_v0  ;;  %v276_v2 = vld [vmem:[%s237_s13] sm:$0xff]  ;;  %s1047_s9 = smov 64   ;;  %s1048_s10 = smov 120   ;;  %vm357_vm1 = vcmask 1043456   ;;  %vm353_vm2 = vcmask 64512   ;;  %vm588_vm3 = vcmask 130048  }
  0x32   : > { %v277_v3 = vpack.c.bf16 %v276_v2, %v276_v2  ;;  %v862_v4 = vld [vmem:[%s1281_s2] ss:$0 sm:$0xff]  ;;  %s1049_s11 = smov 104   ;;  %s1050_s14 = smov 112   ;;  %vm590_vm4 = vcmask 195584  }
  0x33   : > { %s1051_s27 = smov 56   ;;  %s1052_s28 = smov 48  }
  0x34   : > { %s1053_s29 = smov 8   ;;  %s1054_s30 = smov 40  }
  0x35   : > { %309 = vmatpush.bf16.msra.mxu0 %v777_v1  ;;  %s1055_s16 = smov 16   ;;  %s1056_s7 = smov 24  }
  0x36   : > { %s774_s13 = sshll.u32 %s1111_s25, 3  ;;  %s631_s25 = scalar_lea.sflag [#allocation4], %s1187_s22 }
  0x38   : > { %755 = vmatmul.msk.bf16.vlgmr.msra.gmra.mxu0 %vm298_vm0, %v277_v3 }
  0xb5   : > { %v311_v5 = vpop.f32.mrf.mxu0 }
  0xb6   : > { %v312_v6 = vadd.f32 %v862_v4, %v311_v5 }
  0xb8   : > { %v315_v7 = vpack.c.bf16 %v312_v6, %v312_v6  ;;  %317 = vrot.lane.b32.xlu0 %v312_v6, %s1046_s17  ;;  %s641_s17 = scalar_lea.hbm %s1284_s5, %s774_s13 }
  0xba   : > { %v387_v8 = vunpack.c.l.b16 %v315_v7 }
  0xbc   : > { %v1205_v9 = vpack.c.b16 %v387_v8, %v387_v8 }
  0xbd   : > { %v313_v10 = vpop.f32.mrf.mxu0 }
  0xbe   : > { %389 = vrot.lane.b32.xlu2 %v1205_v9, %s1047_s9 }
  0xc6   : > { %411 = vrot.lane.b32.xlu2 %v1205_v9, %s1048_s10 }
  0xce   : > { %521 = vrot.lane.b32.xlu2 %v1205_v9, %s1049_s11  ;;  %s274_s11 = scalar_lea.vmem [#allocation8], %s743_s6  ;;  %s990_s6 = scalar_lea.hbm %s1284_s5, 16 }
 0x118   : > { %v390_v11 = vpop.permute.xlu2 %389 }
 0x119   : > { %v395_v12 = vsel %vm357_vm1, %v390_v11, 0 }
 0x11a   : > { %404 = vmatpush.bf16.msra.mxu2 %v395_v12 }
 0x120   : > { %v412_v20 = vpop.permute.xlu2 %411 }
 0x128   : > { %v522_v25 = vpop.permute.xlu2 %521 }
 0x12a   : > { %v318_v13 = vpop.permute.xlu0 %317 }
 0x12b   : > { %320 = vxpose.xlu0.b32.start.end [1/1] (short) (narrow) %v318_v13, 32 }
 0x1cf   : > { %v336_v14 = vpop.trf.xlu0 }
 0x1d0   : > { %v352_v15 = vpack.c.bf16 %v336_v14, %v336_v14 }
 0x1d2   : > { %v359_v16 = vsel %vm357_vm1, %v352_v15, 0 }
 0x1d3   : > { %368 = vmatpush.bf16.msra.mxu1 %v359_v16 }
 0x1d6   : > { %756 = vmatmul.msk.bf16.vlgmr.msra.gmra.mxu1 %vm353_vm2, %v315_v7 }
 0x1d7   : > { %v337_v17 = vpop.trf.xlu0 }
 0x1d8   : > { %v410_v18 = vpack.c.bf16 %v337_v17, %v337_v17 }
 0x1da   : > { %v417_v19 = vsel %vm357_vm1, %v410_v18, 0 }
 0x1db   : > { %426 = vmatpush.bf16.msra.mxu3 %v417_v19 }
 0x1de   : > { %758 = vmatmul.msk.bf16.vlgmr.msra.gmra.mxu3 %vm353_vm2, %v412_v20 }
 0x1df   : > { %v338_v21 = vpop.trf.xlu0 }
 0x1e0   : > { %v465_v45 = vpack.c.bf16 %v338_v21, %v338_v21 }
 0x1e2   : > { %v472_v46 = vsel %vm357_vm1, %v465_v45, 0 }
 0x1e3   : > { %481 = vmatpush.bf16.msrb.mxu2 %v472_v46 }
 0x1e7   : > { %v339_v22 = vpop.trf.xlu0 }
 0x1e8   : > { %v520_v23 = vpack.c.bf16 %v339_v22, %v339_v22 }
 0x1ea   : > { %v527_v24 = vsel %vm357_vm1, %v520_v23, 0 }
 0x1eb   : > { %536 = vmatpush.bf16.msrb.mxu0 %v527_v24 }
 0x1ee   : > { %762 = vmatmul.msk.bf16.vlgmr.msrb.gmra.mxu0 %vm353_vm2, %v522_v25 }
 0x253   : > { %v370_v26 = vpop.f32.mrf.mxu1 }
 0x254   : > { %v374_v27 = vsel %vm353_vm2, %v370_v26, -inf }
 0x255   : > { %375 = vmax.xlane.f32.xlu1 %v374_v27  ;;  %v780_v27 = vld [vmem:[#allocation7 + $0x8] sm:$0xff] }
 0x25b   : > { %v372_v28 = vpop.f32.mrf.mxu1 }
 0x25c   : > { %v779_v28 = vld [vmem:[#allocation7] sm:$0xff] }
 0x261   : > { %v428_v29 = vpop.f32.mrf.mxu3 }
 0x262   : > { %v432_v30 = vsel %vm353_vm2, %v428_v29, -inf }
 0x263   : > { %433 = vmax.xlane.f32.xlu2 %v432_v30 }
 0x269   : > { %v430_v31 = vpop.f32.mrf.mxu3 }
 0x26b   : > { %v538_v32 = vpop.f32.mrf.mxu0 }
 0x26c   : > { %v542_v33 = vsel %vm353_vm2, %v538_v32, -inf }
 0x26d   : > { %543 = vmax.xlane.f32.xlu0 %v542_v33 }
 0x273   : > { %v540_v34 = vpop.f32.mrf.mxu0 }
 0x2c8   : > { %v376_v35 = vpop.xlane.xlu1 %375 }
 0x2c9   : > { %v377_v36 = vsub.f32 %v370_v26, %v376_v35 }
 0x2cb   : > { %v378_v37 = vmul.f32 1.442695, %v377_v36  ;;  %v863_v36 = vld [vmem:[%s1283_s4] ss:$0 sm:$0xff] }
 0x2cd   : > { %864 = vpow2.f32 %v378_v37 }
 0x2d3   : > { %v865_v38 = vpop.eup %864 }
 0x2d4   : > { %v380_v39 = vsel %vm353_vm2, %v865_v38, 0.0 }
 0x2d5   : > { %381 = vadd.xlane.f32.xlu1 %v380_v39 }
 0x2d6   : > { %v434_v40 = vpop.xlane.xlu2 %433 }
 0x2d7   : > { %v435_v41 = vsub.f32 %v428_v29, %v434_v40 }
 0x2d9   : > { %v436_v42 = vmul.f32 1.442695, %v435_v41 }
 0x2db   : > { %866 = vpow2.f32 %v436_v42 }
 0x2e0   : > { %v544_v61 = vpop.xlane.xlu0 %543 }
 0x2e1   : > { %v867_v43 = vpop.eup %866  ;;  %v545_v62 = vsub.f32 %v538_v32, %v544_v61 }
 0x2e2   : > { %v438_v44 = vsel %vm353_vm2, %v867_v43, 0.0 }
 0x2e3   : > { %439 = vadd.xlane.f32.xlu2 %v438_v44  ;;  %v546_v1 = vmul.f32 1.442695, %v545_v62 }
 0x2ee   : > { %466 = vrot.lane.b32.xlu1 %v1205_v9, %s1050_s14  ;;  %s643_s14 = sshll.u32 %s274_s11, 4  ;;  %s644_s14 = int_to_ptr.vmem [resolvable:$true] %s643_s14 }
 0x2fb   : > { %444 = vrot.lane.b32.xlu2 %v1205_v9, %s1051_s27  ;;  %s645_s27 = sshll.u32 %s641_s17, 4  ;;  %s646_s27 = int_to_ptr.hbm [resolvable:$true] %s645_s27 }
 0x303   : > { %499 = vrot.lane.b32.xlu2 %v1205_v9, %s1052_s28  ;;  %s984_s28 = sshra.s32 %s646_s27, 4  ;;  %s985_s28 = int_to_ptr.hbm [resolvable:$true] %s984_s28 }
 0x304   : > { %p991_p12 = scmp.lt.s32.totalorder %s985_s28, %s1284_s5 }
 0x348   : > { %v382_v47 = vpop.xlane.xlu1 %381 }
 0x349   : > { %868 = vrcp.f32 %v382_v47 }
 0x34f   : > { %v869_v48 = vpop.eup %868 }
 0x350   : > { %v384_v49 = vmul.f32 %v869_v48, %v865_v38 }
 0x352   : > { %v385_v50 = vpack.c.bf16 %v384_v49, %v384_v49 }
 0x354   : > { %757 = vmatmul.msk.bf16.vlgmr.msra.gmra.mxu2 %vm353_vm2, %v385_v50 }
 0x355   : > { %622 = vmatpush.bf16.msra.mxu2 %v780_v27 }
 0x356   : > { %v440_v51 = vpop.xlane.xlu2 %439 }
 0x357   : > { %870 = vrcp.f32 %v440_v51 }
 0x358   : > { %872 = vpow2.f32 %v546_v1 }
 0x359   : > { %623 = vmatpush.bf16.msra.mxu2 %v779_v28 }
 0x35d   : > { %v871_v52 = vpop.eup %870 }
 0x35e   : > { %v442_v53 = vmul.f32 %v871_v52, %v867_v43  ;;  %v445_v54 = vpop.permute.xlu2 %444  ;;  %v873_v5 = vpop.eup %872 }
 0x35f   : > { %v450_v55 = vsel %vm357_vm1, %v445_v54, 0  ;;  %v548_v7 = vsel %vm353_vm2, %v873_v5, 0.0 }
 0x360   : > { %459 = vmatpush.bf16.msrb.mxu1 %v450_v55  ;;  %v443_v56 = vpack.c.bf16 %v442_v53, %v442_v53  ;;  %v467_v57 = vpop.permute.xlu1 %466 }
 0x363   : > { %759 = vmatmul.msk.bf16.vlgmr.msrb.gmra.mxu1 %vm353_vm2, %v443_v56 }
 0x364   : > { %760 = vmatmul.msk.bf16.vlgmr.msrb.gmra.mxu2 %vm353_vm2, %v467_v57 }
 0x366   : > { %v500_v58 = vpop.permute.xlu2 %499 }
 0x367   : > { %v505_v59 = vsel %vm357_vm1, %v500_v58, 0 }
 0x368   : > { %514 = vmatpush.bf16.msrb.mxu3 %v505_v59 }
 0x3d7   : > { %v406_v60 = vpop.f32.mrf.mxu2 }
 0x3df   : > { %v408_v63 = vpop.f32.mrf.mxu2 }
 0x3e0   : > { %v461_v0 = vpop.f32.mrf.mxu1 }
 0x3e1   : > { %576 = vrot.lane.b32.xlu2 %v461_v0, %s1053_s29  ;;  %s986_s29 = scalar_lea.hbm %s985_s28, 8 }
 0x3e2   : > { %p987_p1 = scmp.ne.s32.totalorder %s985_s28, %s986_s29  ;;  %p992_p7 = scmp.lt.s32.totalorder %s990_s6, %s986_s29 }
 0x3e4   : > { %p988_p3 = pnand %p987_p1, %p1156_p4  ;;  %p993_p8 = por %p992_p7, %p991_p12 }
 0x3e6   : > { %p989_p5 = pneg %p988_p3 }
 0x3e7   : > { %v483_v2 = vpop.f32.mrf.mxu2 }
 0x3e8   : > { %v463_v3 = vpop.f32.mrf.mxu1  ;;  %v487_v4 = vsel %vm353_vm2, %v483_v2, -inf  ;;  %p994_p9 = pnand %p993_p8, %p989_p5 }
 0x3e9   : > { %488 = vmax.xlane.f32.xlu1 %v487_v4 }
 0x3ef   : > { %v485_v6 = vpop.f32.mrf.mxu2 }
 0x3f1   : > { %549 = vadd.xlane.f32.xlu1 %v548_v7 }
 0x43b   : > { %v577_v29 = vpop.permute.xlu2 %576 }
 0x43c   : > { %v587_v31 = vsel %vm353_vm2, %v406_v60, %v577_v29 }
 0x45c   : > { %v489_v8 = vpop.xlane.xlu1 %488 }
 0x45d   : > { %v490_v10 = vsub.f32 %v483_v2, %v489_v8 }
 0x45f   : > { %v491_v11 = vmul.f32 1.442695, %v490_v10 }
 0x461   : > { %874 = vpow2.f32 %v491_v11 }
 0x464   : > { %v550_v14 = vpop.xlane.xlu1 %549 }
 0x467   : > { %v875_v12 = vpop.eup %874 }
 0x468   : > { %v493_v13 = vsel %vm353_vm2, %v875_v12, 0.0 }
 0x469   : > { %494 = vadd.xlane.f32.xlu1 %v493_v13 }
 0x482   : > { %554 = vrot.lane.b32.xlu1 %v1205_v9, %s1054_s30 }
 0x4dc   : > { %v495_v15 = vpop.xlane.xlu1 %494 }
 0x4dd   : > { %876 = vrcp.f32 %v495_v15 }
 0x4de   : > { %878 = vrcp.f32 %v550_v14 }
 0x4e3   : > { %v877_v16 = vpop.eup %876 }
 0x4e4   : > { %v497_v17 = vmul.f32 %v877_v16, %v875_v12  ;;  %v879_v19 = vpop.eup %878 }
 0x4e5   : > { %v552_v20 = vmul.f32 %v879_v19, %v873_v5 }
 0x4e6   : > { %v498_v18 = vpack.c.bf16 %v497_v17, %v497_v17 }
 0x4e7   : > { %v553_v23 = vpack.c.bf16 %v552_v20, %v552_v20 }
 0x4e8   : > { %761 = vmatmul.msk.bf16.vlgmr.msrb.gmra.mxu3 %vm353_vm2, %v498_v18 }
 0x4f4   : > { %v555_v21 = vpop.permute.xlu1 %554 }
 0x4f5   : > { %v560_v22 = vsel %vm357_vm1, %v555_v21, 0 }
 0x4f6   : > { %569 = vmatpush.bf16.msra.mxu1 %v560_v22 }
 0x4f9   : > { %763 = vmatmul.msk.bf16.vlgmr.msra.gmra.mxu1 %vm353_vm2, %v553_v23 }
 0x56b   : > { %v516_v24 = vpop.f32.mrf.mxu3 }
 0x56c   : > { %580 = vrot.lane.b32.xlu2 %v516_v24, %s1055_s16 }
 0x573   : > { %v518_v9 = vpop.f32.mrf.mxu3 }
 0x576   : > { %v571_v25 = vpop.f32.mrf.mxu1 }
 0x577   : > { %584 = vrot.lane.b32.xlu2 %v571_v25, %s1056_s7 }
 0x57e   : > { %v573_v26 = vpop.f32.mrf.mxu1 }
 0x5c6   : > { %v581_v30 = vpop.permute.xlu2 %580 }
 0x5c7   : > { %v589_v32 = vsel %vm588_vm3, %v587_v31, %v581_v30 }
 0x5d1   : > { %v585_v33 = vpop.permute.xlu2 %584 }
 0x5d2   : > { %v591_v34 = vsel %vm590_vm4, %v589_v32, %v585_v33 }
 0x5d3   : > { %v592_v35 = vpack.c.bf16 %v591_v34, %v591_v34 }
 0x5d5   : > { %772 = vmatmul.msk.bf16.vlgmr.msra.gmra.mxu2 %vm298_vm0, %v592_v35 }
 0x658   : > { %v625_v37 = vpop.f32.mrf.mxu2 }
 0x659   : > { %v626_v38 = vadd.f32 %v863_v36, %v625_v37 }
 0x65b   : > { %629 = vst.msk [vmem:[%s274_s11] sm:$0xff] %vm298_vm0, %v626_v38 }
 0x65c   : > { %997 = shalt.err (!%p994_p9)
}
 0x65d   : > { %791 = dma.vmem_to_hbm [thread:$0]  (%p1156_p4), %s644_s14, 128, %s646_s27, %s631_s25  }
 0x660   : > { %v627_v39 = vpop.f32.mrf.mxu2 }
 0x661 PF: > { %s657_s22 = sand.u32 1, %s1028_s18   ;;  %p1291_p10 = scmp.ge.s32.totalorder %s1040_s21, 2 }
 0x662   : > { %s658_s26 = scalar_lea.sflag [#allocation4], %s657_s22 }
 0x663   : > { %p805_p13 = pnand %p1291_p10, %p1160_p6 }
 0x665   : > { %p806_p11 = pneg %p805_p13 }
 0x667   : > { %1023 = dma.done.wait (%p806_p11), %s658_s26, 128  }
 0x668   : > { %1025 = vsyncadd (%p806_p11), %s658_s26, 4294967168  ;;  %p19_p0 = scmp.ge.s32.totalorder %s1130_s12, 4   ;;  %s1292_s18 = smov %s1032_s19 }
 0x669   : > { %s1293_s19 = smov %s1036_s20  ;;  %s1294_s20 = smov %s1141_s15 }
 0x66a   : > { %s1295_s21 = smov %s1130_s12  ;;  %21 = sbr.rel (!%p19_p0) target bundleno = 6 (0x6), region = 93 }
 0x66f   :  { %664 = vsyncpa [#allocation3], 1 }
 0x670   :  { %666 = vsyncpa [#allocation3 + $0x1], 1 }
 0x671   :  { %667 = vsyncpa [#allocation6], 1 }
 0x672   :  { %668 = vsyncpa [#allocation4], 1 }
 0x673   :  { %670 = vsyncpa [#allocation4 + $0x1], 1 }

</bundles_post_ra>
